<compile_context>
chip_gen: v7x
topology: tpu7x:2x2x1
jax: 0.10.0
libtpu: 0.0.40
codegen_flags: <defaults>
</compile_context>

<pallas_src>
import functools

import jax
import jax.numpy as jnp
from jax.experimental import pallas as pl
from jax.experimental.pallas import tpu as pltpu


_CLAMP_MIN = 1e-05
_CLAMP_MAX = 100000.0
_REDUCTION_TYPES = (0, 1, 2, 3)

_MAX_TILE_ROWS = 2048            # up to (2048, 128) fp32 = 1 MiB per slab
_VMEM_BUDGET = 12 * 1024 * 1024  # double-buffered blocks; safe on v5e/v6e/v7x
_SMALL_N_FALLBACK = 65536        # below this, fused XLA beats pallas overhead


def _cdiv(a, b):
    return -(-a // b)


def _apply_elemwise(x, layer_type, eps):
    """Elementwise branch ops (layer_type 4..14), computed in fp32."""
    if layer_type == 4:
        return -x
    if layer_type == 5:                         # identity
        return x
    if layer_type == 6:                         # signed log
        return jnp.sign(x) * jnp.log(jnp.abs(x) + eps)
    if layer_type == 7:                         # square
        return x * x
    if layer_type == 8:                         # signed reciprocal (exact)
        return jnp.sign(x) / (jnp.abs(x) + eps)
    if layer_type == 9:                         # sigmoid
        return jax.nn.sigmoid(x)
    if layer_type == 10:                        # tanh
        return jnp.tanh(x)
    if layer_type == 11:                        # relu
        return jnp.maximum(x, 0.0)
    if layer_type == 12:                        # abs
        return jnp.abs(x)
    if layer_type == 13:                        # signed sqrt
        return jnp.sign(x) * jnp.sqrt(jnp.abs(x) + eps)
    if layer_type == 14:                        # exp
        return jnp.exp(x)
    raise ValueError("Unknown layer_type {}".format(layer_type))


# --------------------------------------------------------------------------
# Kernels
# --------------------------------------------------------------------------
def _reduce_kernel(*refs, layer_type, k):
    """Reduce over K branches with elementwise VPU ops.

    refs[:k] : K lane-dense (tile_rows, 128) input blocks (original dtype)
    refs[k]  : (tile_rows, 128) fp32 output block
    """
    in_refs, o_ref = refs[:k], refs[k]
    acc = in_refs[0][...].astype(jnp.float32)
    for j in range(1, k):                       # K is tiny and static: unroll
        xj = in_refs[j][...].astype(jnp.float32)
        if layer_type == 0:                     # sum
            acc = acc + xj
        elif layer_type == 1:                   # prod
            acc = acc * xj
        elif layer_type == 2:                   # max
            acc = jnp.maximum(acc, xj)
        else:                                   # min (layer_type == 3)
            acc = jnp.minimum(acc, xj)
    o_ref[...] = jnp.clip(acc, _CLAMP_MIN, _CLAMP_MAX).astype(o_ref.dtype)


def _elemwise_kernel(*refs, layer_type, eps, k):
    """Elementwise op applied to each of the K lane-dense branch blocks.

    refs[:k] : K (tile_rows, 128) input blocks (original dtype)
    refs[k]  : (K, tile_rows, 128) fp32 output block
    """
    in_refs, o_ref = refs[:k], refs[k]
    for j in range(k):
        x = in_refs[j][...].astype(jnp.float32)
        r = _apply_elemwise(x, layer_type, eps)
        o_ref[j, :, :] = jnp.clip(r, _CLAMP_MIN, _CLAMP_MAX).astype(o_ref.dtype)


# --------------------------------------------------------------------------
# Wrapper
# --------------------------------------------------------------------------
def _pick_tile_rows(rows, n_in_slabs, in_itemsize, n_out_slabs):
    """Largest row tile whose double-buffered in+out blocks fit the budget."""
    per_row = 2 * 128 * (n_in_slabs * in_itemsize + n_out_slabs * 4)
    cap = max(8, (_VMEM_BUDGET // per_row) // 8 * 8)
    tile = min(_MAX_TILE_ROWS, cap)
    if rows <= tile:
        return rows        # single full-extent block (always a legal shape)
    return tile            # multiple of 8; last grid block may be partial


def _loss_formula_pallas(branches, layer_type, eps, *, branch_major=False,
                         force_pallas=False, max_tile_rows=None):
    """branches: list of K flattened (N,) branch vectors (same N, any dtype).

    Returns (N,) for reduction layer_types, (N, K) for elementwise ones
    (or (K, N) when branch_major=True, skipping the layout transpose).
    """
    k = len(branches)
    if k == 0:
        raise ValueError("LossLayer: no un-skipped previous layers to combine")
    n = int(branches[0].shape[0])
    if any(int(b.shape[0]) != n for b in branches):
        raise ValueError("LossLayer: all selected prev_layers must have the "
                         "same number of elements")

    is_reduction = layer_type in _REDUCTION_TYPES
    eps = float(eps)

    # Tiny problems: a single fused XLA expression beats pallas_call overhead.
    if n < _SMALL_N_FALLBACK and not force_pallas:
        cols = jnp.stack([b.astype(jnp.float32) for b in branches], axis=1)
        if layer_type == 0:
            out = jnp.sum(cols, axis=1)
        elif layer_type == 1:
            out = jnp.prod(cols, axis=1)
        elif layer_type == 2:
            out = jnp.max(cols, axis=1)
        elif layer_type == 3:
            out = jnp.min(cols, axis=1)
        else:
            out = _apply_elemwise(cols, layer_type, eps)
        out = jnp.clip(out, _CLAMP_MIN, _CLAMP_MAX)
        return out.T if (branch_major and not is_reduction) else out

    # Lane-dense (rows, 128) view of each branch.  When N % 128 == 0 the
    # reshape is free (metadata only); otherwise pad only to the next 128.
    n128 = _cdiv(n, 128) * 128
    rows = n128 // 128
    if n128 != n:
        branches = [jnp.pad(b, (0, n128 - n)) for b in branches]
    slabs = [b.reshape(rows, 128) for b in branches]

    in_itemsize = max(b.dtype.itemsize for b in branches)
    out_slabs = 1 if is_reduction else k
    tile_rows = _pick_tile_rows(rows, k, in_itemsize, out_slabs)
    if max_tile_rows is not None:               # test / tuning hook
        tile_rows = min(tile_rows, max(8, (int(max_tile_rows) // 8) * 8))
        if tile_rows >= rows:
            tile_rows = rows
    num_tiles = _cdiv(rows, tile_rows)

    in_specs = [pl.BlockSpec((tile_rows, 128), lambda i: (i, 0))
                for _ in range(k)]
    cparams = pltpu.CompilerParams(dimension_semantics=("parallel",))

    if is_reduction:
        kernel = functools.partial(_reduce_kernel, layer_type=layer_type, k=k)
        out = pl.pallas_call(
            kernel,
            out_shape=jax.ShapeDtypeStruct((rows, 128), jnp.float32),
            grid=(num_tiles,),
            in_specs=in_specs,
            out_specs=pl.BlockSpec((tile_rows, 128), lambda i: (i, 0)),
            compiler_params=cparams,
        )(*slabs)
        return out.reshape(n128)[:n]                     # (N,)

    kernel = functools.partial(_elemwise_kernel, layer_type=layer_type,
                               eps=eps, k=k)
    out = pl.pallas_call(
        kernel,
        out_shape=jax.ShapeDtypeStruct((k, rows, 128), jnp.float32),
        grid=(num_tiles,),
        in_specs=in_specs,
        out_specs=pl.BlockSpec((k, tile_rows, 128), lambda i: (0, i, 0)),
        compiler_params=cparams,
    )(*slabs)
    out = out.reshape(k, n128)[:, :n]                    # (K, N), lane-dense
    if branch_major:
        return out
    # (N, K) as in the PyTorch module; this transpose is the one remaining
    # extra HBM pass -- use branch_major=True when the consumer allows (K, N).
    return out.T


class LossLayer:
    """JAX/Pallas port of the PyTorch LossLayer (no learnable parameters)."""

    def __init__(self, layer_id, in_planes, out_planes, epsilon=1e-06):
        self.layer_id = layer_id
        self.in_planes = in_planes
        self.out_planes = out_planes
        self.epsilon = epsilon

    def __call__(self, prev_layers, sample_arc, small_epsilon=False,
                 branch_major=False, force_pallas=False, max_tile_rows=None):
        layer_type = int(sample_arc[0])
        skip_indices = sample_arc[1] if self.layer_id > 0 else []

        branches = [jnp.ravel(prev_layers[i])
                    for i, skip in enumerate(skip_indices) if skip != 1]
        eps = 1e-06 if small_epsilon else self.epsilon
        # TODO(synk): output is fp32 (like the reference); emit the input
        # dtype instead if the downstream consumer tolerates it (halves store
        # traffic for bf16 inputs).
        return _loss_formula_pallas(branches, layer_type, eps,
                                    branch_major=branch_major,
                                    force_pallas=force_pallas,
                                    max_tile_rows=max_tile_rows)


# --------------------------------------------------------------------------
# Pure-JAX reference mirroring the PyTorch forward.
# --------------------------------------------------------------------------
def _reference(prev_layers, sample_arc, epsilon):
    layer_type = int(sample_arc[0])
    skip_indices = sample_arc[1]
    cols = [jnp.reshape(prev_layers[i], (-1, 1))
            for i, s in enumerate(skip_indices) if s != 1]
    out = jnp.concatenate(cols, axis=1).astype(jnp.float32)
    if layer_type == 0:
        out = jnp.sum(out, axis=1)
    elif layer_type == 1:
        out = jnp.prod(out, axis=1)
    elif layer_type == 2:
        out = jnp.max(out, axis=1)
    elif layer_type == 3:
        out = jnp.min(out, axis=1)
    else:
        out = _apply_elemwise(out, layer_type, float(epsilon))
    return jnp.clip(out, _CLAMP_MIN, _CLAMP_MAX)


if __name__ == "__main__":
    key = jax.random.PRNGKey(0)
    ks = jax.random.split(key, 9)

    failures = []

    def check(result, ref, name, rtol=1e-4, atol=1e-5):
        result = jax.block_until_ready(result)
        if result.shape != ref.shape:
            failures.append("%s: shape %s vs %s" % (name, result.shape, ref.shape))
            return
        if not jnp.allclose(result, ref, rtol=rtol, atol=atol):
            err = float(jnp.max(jnp.abs(result - ref)))
            failures.append("%s: max abs err %g" % (name, err))

    # --- main sweep: every layer_type, fp32, N = 2*4*16*16 = 2048, K = 2 ----
    prev_layers = [jax.random.normal(ks[i], (2, 4, 16, 16), dtype=jnp.float32)
                   for i in range(3)]
    skip_indices = [0, 1, 0]                     # keep branches 0 and 2 -> K=2
    layer = LossLayer(layer_id=1, in_planes=4, out_planes=4)

    for lt in range(15):
        arc = (lt, skip_indices)
        res = layer(prev_layers, arc, force_pallas=True)
        check(res, _reference(prev_layers, arc, layer.epsilon),
              "fp32 lt=%d" % lt)

    # --- bf16 pass-through (no wrapper-side fp32 copy) ----------------------
    prev_bf16 = [p.astype(jnp.bfloat16) for p in prev_layers]
    for lt in (0, 5):
        arc = (lt, skip_indices)
        res = layer(prev_bf16, arc, force_pallas=True)
        check(res, _reference(prev_bf16, arc, layer.epsilon),
              "bf16 lt=%d" % lt)

    # --- N not a multiple of 128 (exercises the minimal lane pad) -----------
    prev_odd = [jax.random.normal(ks[3 + i], (2, 3, 7, 11), dtype=jnp.float32)
                for i in range(3)]
    for lt in (0, 6):
        arc = (lt, skip_indices)
        res = layer(prev_odd, arc, force_pallas=True)
        check(res, _reference(prev_odd, arc, layer.epsilon),
              "oddN lt=%d" % lt)

    # --- multi-tile grid with a partial last block (rows=20, tile=8) --------
    prev_big = [jax.random.normal(ks[6 + i], (2, 4, 16, 20), dtype=jnp.float32)
                for i in range(3)]
    for lt in (1, 7):
        arc = (lt, skip_indices)
        res = layer(prev_big, arc, force_pallas=True, max_tile_rows=8)
        check(res, _reference(prev_big, arc, layer.epsilon),
              "tiled lt=%d" % lt)

    # --- small-N fused-XLA fallback (the default path at these shapes) ------
    for lt in (3, 9):
        arc = (lt, skip_indices)
        res = layer(prev_layers, arc)
        check(res, _reference(prev_layers, arc, layer.epsilon),
              "fallback lt=%d" % lt)

    if failures:
        for f in failures:
            print("FAIL", f)
    else:
        print("KERNEL_OK")
</pallas_src>

<mosaic_0001>
module attributes {stable_mosaic.version = 11 : i64} {
  func.func @_reduce_kernel(%arg0: i32, %arg1: memref<16x128xf32, #tpu.memory_space<vmem>>, %arg2: memref<16x128xf32, #tpu.memory_space<vmem>>, %arg3: memref<16x128xf32, #tpu.memory_space<vmem>>) attributes {dimension_semantics = [#tpu.dimension_semantics<parallel>], iteration_bounds = array<i64: 1>, scalar_prefetch = 0 : i64, scratch_operands = 0 : i64, tpu.core_type = #tpu.core_type<tc>, window_params = [{transform_indices = @transform_0, window_bounds = array<i64: 16, 128>}, {transform_indices = @transform_1, window_bounds = array<i64: 16, 128>}, {transform_indices = @transform_2, window_bounds = array<i64: 16, 128>}]} {
    %c0 = arith.constant 0 : index
    %c0_0 = arith.constant 0 : index
    %0 = vector.load %arg1[%c0, %c0_0] : memref<16x128xf32, #tpu.memory_space<vmem>>, vector<16x128xf32>
    %c0_1 = arith.constant 0 : index
    %c0_2 = arith.constant 0 : index
    %1 = vector.load %arg2[%c0_1, %c0_2] : memref<16x128xf32, #tpu.memory_space<vmem>>, vector<16x128xf32>
    %2 = arith.addf %0, %1 : vector<16x128xf32>
    %cst = arith.constant 9.99999974E-6 : f32
    %cst_3 = arith.constant 1.000000e+05 : f32
    %3 = vector.broadcast %cst : f32 to vector<16x128xf32>
    %4 = arith.maximumf %3, %2 : vector<16x128xf32>
    %5 = vector.broadcast %cst_3 : f32 to vector<16x128xf32>
    %6 = arith.minimumf %5, %4 : vector<16x128xf32>
    %c0_4 = arith.constant 0 : index
    %c0_5 = arith.constant 0 : index
    %7 = vector.load %arg3[%c0_4, %c0_5] : memref<16x128xf32, #tpu.memory_space<vmem>>, vector<16x128xf32>
    tpu.vector_store %arg3[%c0_4, %c0_5], %6 {strides = array<i32>} : memref<16x128xf32, #tpu.memory_space<vmem>>, vector<16x128xf32>,
    return
  }
  func.func @transform_0(%arg0: i32) -> (i32, i32) {
    %c0_i32 = arith.constant 0 : i32
    %c0_i32_0 = arith.constant 0 : i32
    return %arg0, %c0_i32 : i32, i32
  }
  func.func @transform_1(%arg0: i32) -> (i32, i32) {
    %c0_i32 = arith.constant 0 : i32
    %c0_i32_0 = arith.constant 0 : i32
    return %arg0, %c0_i32 : i32, i32
  }
  func.func @transform_2(%arg0: i32) -> (i32, i32) {
    %c0_i32 = arith.constant 0 : i32
    %c0_i32_0 = arith.constant 0 : i32
    return %arg0, %c0_i32 : i32, i32
  }
}

</mosaic_0001>

<bundles_post_ra>
// kernel: tpu_custom_call.1
= control target key start
LH: loop header
LB: loop body
LE: loop exit
PB: predicated region body
PF: predicated region fallthrough
CT: control target
= control target key end

     0   :  { %7 = vsyncpa [#allocation3], 0  ;;  %s212_s0 = inlined_call_operand.hbm [shape: f32[16,128], index: 0, kind: input, shape index: {}]   ;;  %s213_s1 = inlined_call_operand.hbm [shape: f32[16,128], index: 1, kind: input, shape index: {}]   ;;  %s214_s2 = inlined_call_operand.hbm [shape: f32[16,128], index: 2, kind: output, shape index: {}]  }
   0x1   :  { %8 = vsyncpa [#allocation6], 0 }
   0x2   :  { %9 = vsyncpa [#allocation4], 0  ;;  %s147_s9 = smov [#allocation2]   ;;  %s75_s13 = scalar_lea.hbm %s212_s0, 256 }
   0x3   :  { %s15_s10 = sshll.u32 %s147_s9, 4  ;;  %p76_p0 = scmp.ne.s32.totalorder %s212_s0, %s75_s13  ;;  %s16_s10 = int_to_ptr.vmem [resolvable:$true] %s15_s10 }
   0x4   :  { %p79_p1 = scmp.lt.u32.totalorder %s75_s13, %s212_s0 }
   0x6   :  { %p81_p2 = pnand %p79_p1, %p76_p0 }
   0x8   :  { %84 = shalt.err (!%p81_p2)
}
   0x9   :  { %s85_s18 = scalar_lea.vmem %s16_s10, 256  ;;  %p90_p4 = scmp.lt.s32.totalorder %s16_s10, %s16_s10 }
   0xa   :  { %p86_p3 = scmp.ne.s32.totalorder %s16_s10, %s85_s18  ;;  %p91_p5 = scmp.lt.s32.totalorder %s85_s18, %s85_s18 }
   0xc   :  { %p92_p6 = por %p91_p5, %p90_p4 }
   0xe   :  { %p93_p7 = pnand %p92_p6, %p86_p3 }
  0x10   :  { %96 = shalt.err (!%p93_p7)
}
  0x11   :  { %s148_s19 = smov 128   ;;  %s149_s20 = smov 8  }
  0x12   :  { %21 = dma.hbm_to_vmem [thread:$0]  %s212_s0, 256, %s16_s10, [#allocation3], %s148_s19, %s148_s19, %s149_s20  }
  0x13   :  { %s150_s23 = smov [#allocation5]   ;;  %s97_s27 = scalar_lea.hbm %s213_s1, 256 }
  0x14   :  { %s27_s24 = sshll.u32 %s150_s23, 4  ;;  %p98_p8 = scmp.ne.s32.totalorder %s213_s1, %s97_s27  ;;  %s28_s24 = int_to_ptr.vmem [resolvable:$true] %s27_s24 }
  0x15   :  { %p101_p9 = scmp.lt.u32.totalorder %s97_s27, %s213_s1 }
  0x17   :  { %p103_p10 = pnand %p101_p9, %p98_p8 }
  0x19   :  { %106 = shalt.err (!%p103_p10)
}
  0x1a   :  { %s107_s4 = scalar_lea.vmem %s28_s24, 256  ;;  %p112_p12 = scmp.lt.s32.totalorder %s28_s24, %s28_s24 }
  0x1b   :  { %p108_p11 = scmp.ne.s32.totalorder %s28_s24, %s107_s4  ;;  %p113_p13 = scmp.lt.s32.totalorder %s107_s4, %s107_s4 }
  0x1d   :  { %p114_p0 = por %p113_p13, %p112_p12 }
  0x1f   :  { %p115_p1 = pnand %p114_p0, %p108_p11 }
  0x21   :  { %118 = shalt.err (!%p115_p1)
}
  0x22   :  { %33 = dma.hbm_to_vmem [thread:$0]  %s213_s1, 256, %s28_s24, [#allocation6], %s148_s19, %s148_s19, %s149_s20  }
  0x23   :  { %141 = dma.done.wait [#allocation3], 256  }
  0x24   :  { %142 = vsyncadd [#allocation3], 4294967040 }
  0x25   :  { %143 = dma.done.wait [#allocation6], 256  }
  0x26   :  { %144 = vsyncadd [#allocation6], 4294967040  ;;  %v40_v0 = vld [vmem:[#allocation2] sm:$0xff]  ;;  %v42_v1 = vld [vmem:[#allocation5] sm:$0xff]  ;;  %s151_s6 = smov [#allocation7]  }
  0x27   :  { %v41_v2 = vld [vmem:[#allocation2 + $0x8] sm:$0xff]  ;;  %v44_v3 = vadd.f32 %v42_v1, %v40_v0  ;;  %v43_v4 = vld [vmem:[#allocation5 + $0x8] sm:$0xff]  ;;  %s57_s7 = sshll.u32 %s151_s6, 4  ;;  %s58_s7 = int_to_ptr.vmem [resolvable:$true] %s57_s7 }
  0x28   :  { %v45_v5 = vadd.f32 %v43_v4, %v41_v2  ;;  %s119_s1 = scalar_lea.vmem %s58_s7, 256  ;;  %p124_p3 = scmp.lt.s32.totalorder %s58_s7, %s58_s7 }
  0x29   :  { %v46_v6 = vmax.f32 %v44_v3, 1e-05  ;;  %p120_p2 = scmp.ne.s32.totalorder %s58_s7, %s119_s1  ;;  %p125_p4 = scmp.lt.s32.totalorder %s119_s1, %s119_s1 }
  0x2a   :  { %v47_v7 = vmax.f32 %v45_v5, 1e-05 }
  0x2b   :  { %v48_v8 = vmin.f32 %v46_v6, 100000.0  ;;  %p126_p5 = por %p125_p4, %p124_p3 }
  0x2c   :  { %v49_v9 = vmin.f32 %v47_v7, 100000.0 }
  0x2d   :  { %50 = vst [vmem:[#allocation7] sm:$0xff] %v48_v8  ;;  %p127_p6 = pnand %p126_p5, %p120_p2 }
  0x2e   :  { %51 = vst [vmem:[#allocation7 + $0x8] sm:$0xff] %v49_v9 }
  0x2f   :  { %130 = shalt.err (!%p127_p6)
}
  0x30   :  { %s131_s10 = scalar_lea.hbm %s214_s2, 256 }
  0x31   :  { %p132_p7 = scmp.ne.s32.totalorder %s214_s2, %s131_s10  ;;  %p135_p8 = scmp.lt.u32.totalorder %s131_s10, %s214_s2 }
  0x33   :  { %p137_p9 = pnand %p135_p8, %p132_p7 }
  0x35   :  { %140 = shalt.err (!%p137_p9)
}
  0x36   :  { %63 = dma.vmem_to_hbm [thread:$0]  %s58_s7, 256, %s214_s2, [#allocation4], %s148_s19, %s148_s19, %s149_s20  }
  0x37   :  { %145 = dma.done.wait [#allocation4], 256  }
  0x38   :  { %146 = vsyncadd [#allocation4], 4294967040 }
  0x39   :  { %67 = vsyncpa [#allocation3], 1 }
  0x3a   :  { %68 = vsyncpa [#allocation6], 1 }
  0x3b   :  { %69 = vsyncpa [#allocation4], 1 }

</bundles_post_ra>
